<compile_context>
chip_gen: v7x
topology: tpu7x:2x2x1
jax: 0.10.0
libtpu: 0.0.40
codegen_flags: <defaults>
</compile_context>

<pallas_src>
import jax
import jax.numpy as jnp
from jax.experimental import pallas as pl
from jax.experimental.pallas import tpu as pltpu

NEG_SENTINEL = jnp.float32(-1e30)   # "no edge stored" marker
NEG_THRESH = -1e29                  # mask test: S > NEG_THRESH  <=>  stored

_MB = 1024 * 1024


def _round_up(x, m):
    return -(-x // m) * m


def _vmem_limit(nbytes):
    # working set + headroom; floor at 32 MiB, stay under v7x's 64 MiB physical.
    return int(min(max(2 * nbytes, 32 * _MB), 56 * _MB))


# ----------------------------- Pallas kernels ------------------------------

def linear_kernel(x_ref, wt_ref, b_ref, h_ref):
    # h = x @ W^T + b  (W pre-transposed to [Din, Dout]; weights stay resident)
    # TODO(synk): for realistic Din/Dout, cast x/W^T to bf16 (keep f32 accum via
    # preferred_element_type) and pad feature dims to multiples of 128.
    h_ref[...] = (
        jnp.dot(x_ref[...], wt_ref[...], preferred_element_type=jnp.float32)
        + b_ref[...]
    )


def edge_kernel(rows_ref, cols_ref, ht_ref, a_ref, ev_ref):
    # Batched fused gather + score for one tile of TE edges:
    #   ev[e] = ReLU( a . |h[rows[e]] - h[cols[e]]| )
    # Endpoint gather as a one-hot selection matmul on the MXU:
    #   diff^T = h^T @ (onehot(rows) - onehot(cols))   -> (Dout, TE)
    # so there is no per-edge loop, and the store is one lane-dense (1, TE) row.
    Np = ht_ref.shape[1]
    TE = ev_ref.shape[-1]
    r = rows_ref[0]                                            # (1, TE) int32
    c = cols_ref[0]                                            # (1, TE) int32
    node_ids = jax.lax.broadcasted_iota(jnp.int32, (Np, TE), 0)
    sel = ((node_ids == r).astype(jnp.float32)
           - (node_ids == c).astype(jnp.float32))              # (Np, TE)
    diff_t = jnp.dot(ht_ref[...], sel,
                     preferred_element_type=jnp.float32)       # (Dout, TE)
    score = jnp.dot(a_ref[...], jnp.abs(diff_t),
                    preferred_element_type=jnp.float32)        # (1, TE)
    ev_ref[...] = jnp.maximum(score, 0.0).reshape(1, 1, TE)


def graph_stats_kernel(s_ref, rmax_ref, deninv_ref, colsum_ref):
    # Row-tiled pass over sentinel-encoded S:
    #   rmax[i]   = max over stored entries of row i
    #   deninv[i] = 1 / sum_j exp(S[i,j]-rmax[i])   (0 if the row stores nothing)
    #   colsum[j] = sum_i P[i,j]  (accumulated per split; splits summed in glue)
    # exp() touches sentinel entries before the mask select; safe in f32
    # (underflow to 0 / exp(0)=1 is discarded by the mask) — keep the invariant.
    i = pl.program_id(1)

    @pl.when(i == 0)
    def _():
        colsum_ref[...] = jnp.zeros_like(colsum_ref)

    S = s_ref[...]                                             # (TRs, Np)
    mask = S > NEG_THRESH
    rmax = jnp.max(S, axis=1, keepdims=True)
    e = jnp.where(mask, jnp.exp(S - rmax), 0.0)                # single select
    den = jnp.sum(e, axis=1, keepdims=True)
    deninv = jnp.where(den > 0.0, 1.0 / den, 0.0)
    rmax_ref[...] = rmax
    deninv_ref[...] = deninv
    colsum_ref[...] += jnp.sum(e * deninv, axis=0, keepdims=True)


def graph_norm_kernel(s_ref, scol_ref, rmax_r_ref, deninv_r_ref, dinv_r_ref,
                      rmax_c_ref, deninv_c_ref, dinv_c_ref, g_ref):
    # (TR, TC) tile of the final normalized graph:
    #   P   from the row block of S + row stats of the tile's rows
    #   P^T from the matching *column* block of S, transposed in-kernel (XLU),
    #       + row stats of the tile's columns  -> no XLA S.T materialization
    #   G = D^{-1/2} (0.5*(P + P^T) + I) D^{-1/2}
    S = s_ref[...]                                             # (TR, TC)
    St = scol_ref[...].T                                       # (TC, TR) -> (TR, TC)
    P = jnp.where(S > NEG_THRESH,
                  jnp.exp(S - rmax_r_ref[...]), 0.0) * deninv_r_ref[...]
    Pt = jnp.where(St > NEG_THRESH,
                   jnp.exp(St - rmax_c_ref[...]), 0.0) * deninv_c_ref[...]
    G = 0.5 * (P + Pt)

    TR, TC = S.shape
    r0 = pl.program_id(0) * TR
    c0 = pl.program_id(1) * TC
    row_ids = jax.lax.broadcasted_iota(jnp.int32, (TR, TC), 0) + r0
    col_ids = jax.lax.broadcasted_iota(jnp.int32, (TR, TC), 1) + c0
    G = jnp.where(row_ids == col_ids, G + 1.0, G)              # + identity

    g_ref[...] = dinv_r_ref[...] * G * dinv_c_ref[...]


# ----------------------------- pallas_call wrappers -------------------------

def _call_linear(x_p, w_t, b_row, TM):
    Np, Din = x_p.shape
    Dout = w_t.shape[1]
    ws = 2 * (TM * Din + TM * Dout) * 4 + 2 * (Din * Dout + Dout) * 4
    return pl.pallas_call(
        linear_kernel,
        out_shape=jax.ShapeDtypeStruct((Np, Dout), jnp.float32),
        grid=(Np // TM,),
        in_specs=[
            pl.BlockSpec((TM, Din), lambda i: (i, 0)),
            # TODO(synk): pipeline_mode=pl.Buffered(1) on the grid-invariant
            # W^T / bias blocks to drop the pointless second buffer.
            pl.BlockSpec((Din, Dout), lambda i: (0, 0)),
            pl.BlockSpec((1, Dout), lambda i: (0, 0)),
        ],
        out_specs=pl.BlockSpec((TM, Dout), lambda i: (i, 0)),
        compiler_params=pltpu.CompilerParams(
            dimension_semantics=("parallel",),
            vmem_limit_bytes=_vmem_limit(ws)),
    )(x_p, w_t, b_row)


def _call_edges(h_t, a_row, rows3, cols3, TE):
    Dout, Np = h_t.shape
    Gt = rows3.shape[0]
    ws = 2 * Dout * Np * 4 + 4 * Np * TE * 4 + 4 * Dout * TE * 4
    idx_spec = pl.BlockSpec((1, 1, TE), lambda t: (t, 0, 0))
    return pl.pallas_call(
        edge_kernel,
        out_shape=jax.ShapeDtypeStruct((Gt, 1, TE), jnp.float32),
        grid=(Gt,),
        in_specs=[
            idx_spec,                                          # rows (per tile)
            idx_spec,                                          # cols (per tile)
            # TODO(synk): pipeline_mode=pl.Buffered(1) for the grid-invariant
            # resident h^T / a blocks.
            pl.BlockSpec((Dout, Np), lambda t: (0, 0)),        # h^T resident
            pl.BlockSpec((1, Dout), lambda t: (0, 0)),         # a resident
        ],
        out_specs=pl.BlockSpec((1, 1, TE), lambda t: (t, 0, 0)),
        compiler_params=pltpu.CompilerParams(
            dimension_semantics=("parallel",),
            vmem_limit_bytes=_vmem_limit(ws)),
    )(rows3, cols3, h_t, a_row)


def _call_graph_stats(S, TRs):
    Np = S.shape[0]
    n_blocks = Np // TRs
    n_split = 2 if (n_blocks >= 2 and n_blocks % 2 == 0) else 1   # megacore split
    n_inner = n_blocks // n_split
    ws = 2 * TRs * Np * 4 + TRs * Np * 4 + 4 * Np * 4
    rmax, deninv, colsum_parts = pl.pallas_call(
        graph_stats_kernel,
        out_shape=(jax.ShapeDtypeStruct((Np, 1), jnp.float32),
                   jax.ShapeDtypeStruct((Np, 1), jnp.float32),
                   jax.ShapeDtypeStruct((1, n_split * Np), jnp.float32)),
        grid=(n_split, n_inner),
        in_specs=[pl.BlockSpec((TRs, Np), lambda s, i: (s * n_inner + i, 0))],
        out_specs=(pl.BlockSpec((TRs, 1), lambda s, i: (s * n_inner + i, 0)),
                   pl.BlockSpec((TRs, 1), lambda s, i: (s * n_inner + i, 0)),
                   pl.BlockSpec((1, Np), lambda s, i: (0, s))),   # per-split acc
        compiler_params=pltpu.CompilerParams(
            dimension_semantics=("parallel", "arbitrary"),
            vmem_limit_bytes=_vmem_limit(ws)),
    )(S)
    colsum = jnp.sum(colsum_parts.reshape(n_split, Np), axis=0, keepdims=True)
    return rmax, deninv, colsum


def _call_graph_norm(S, rmax_col, deninv_col, dinv_col,
                     rmax_row, deninv_row, dinv_row, TR, TC):
    Np = S.shape[0]
    ws = 6 * TR * TC * 4 + TR * TC * 4 + 8 * (TR + TC) * 4
    return pl.pallas_call(
        graph_norm_kernel,
        out_shape=jax.ShapeDtypeStruct((Np, Np), jnp.float32),
        grid=(Np // TR, Np // TC),
        in_specs=[
            pl.BlockSpec((TR, TC), lambda i, j: (i, j)),       # S row block
            pl.BlockSpec((TC, TR), lambda i, j: (j, i)),       # S column block
            pl.BlockSpec((TR, 1), lambda i, j: (i, 0)),        # rmax   (rows)
            pl.BlockSpec((TR, 1), lambda i, j: (i, 0)),        # deninv (rows)
            pl.BlockSpec((TR, 1), lambda i, j: (i, 0)),        # dinv   (rows)
            pl.BlockSpec((1, TC), lambda i, j: (0, j)),        # rmax   (cols)
            pl.BlockSpec((1, TC), lambda i, j: (0, j)),        # deninv (cols)
            pl.BlockSpec((1, TC), lambda i, j: (0, j)),        # dinv   (cols)
        ],
        out_specs=pl.BlockSpec((TR, TC), lambda i, j: (i, j)),
        compiler_params=pltpu.CompilerParams(
            dimension_semantics=("parallel", "parallel"),
            vmem_limit_bytes=_vmem_limit(ws)),
    )(S, S, rmax_col, deninv_col, dinv_col, rmax_row, deninv_row, dinv_row)


# ----------------------------- forward (module equivalent) ------------------

def graph_learn_forward(x, w, b, a, edges, num_nodes):
    """GraphLearn.forward.  x:[N,Din]; w:[Dout,Din]; b:[Dout]; a:[Dout];
    edges: int32 [2,E].  Returns (h [N,Dout], graph [N,N])."""
    N = num_nodes
    Dout = w.shape[0]

    # ---- padding / tile selection (all blocks (8,128)-aligned) ----
    Np = 256 if N <= 256 else _round_up(N, 512)    # padded node count
    TR = min(Np, 256)                              # norm-kernel row tile
    TC = min(Np, 512)                              # norm-kernel col tile (2-D grid)
    TM = min(Np, 512)                              # linear row tile
    TE = 128                                       # edges per tile (lane-dense)
    TRs = TR                                       # stats tile: bound VMEM vs Np
    while TRs > 8 and TRs * Np * 4 > 6 * _MB:
        TRs //= 2

    # ---- 1) h = x @ W^T + b (row-tiled, megacore-parallel) ----
    x_p = jnp.pad(x.astype(jnp.float32), ((0, Np - N), (0, 0)))
    w_t = jnp.asarray(w.T, jnp.float32)
    b_row = b.reshape(1, Dout).astype(jnp.float32)
    h_p = _call_linear(x_p, w_t, b_row, TM)                    # (Np, Dout)
    h = h_p[:N]

    # ---- 2) edge scores: fused one-hot gather, lane-dense 128-edge tiles ----
    rows = edges[0].astype(jnp.int32)
    cols = edges[1].astype(jnp.int32)
    E = rows.shape[0]
    Ep = _round_up(E, TE)
    Gt = Ep // TE
    rows3 = jnp.pad(rows, (0, Ep - E)).reshape(Gt, 1, TE)
    cols3 = jnp.pad(cols, (0, Ep - E)).reshape(Gt, 1, TE)
    a_row = a.reshape(1, Dout).astype(jnp.float32)
    h_t = jnp.asarray(h_p.T)                                   # (Dout, Np); O(N*Dout)
    ev = _call_edges(h_t, a_row, rows3, cols3, TE).reshape(-1)[:E]

    # ---- 3) dense sentinel-encoded score matrix ----
    # Duplicate edges keep one value (PyTorch sparse coalesce would sum them).
    # TODO(synk): for large E move this scatter into a Pallas kernel with
    # scalar-prefetched indices; XLA's dense scatter is element-serialized.
    S = jnp.full((Np, Np), NEG_SENTINEL, jnp.float32).at[rows, cols].set(ev)

    # ---- 4) per-row softmax stats + column sum of P ----
    rmax, deninv, colsum = _call_graph_stats(S, TRs)           # (Np,1),(Np,1),(1,Np)

    # Degree of G = 0.5*(P+P^T)+I from row/col sums of P (G symmetric).
    # Rows with no stored edge give an all-zero softmax row (the dense reference
    # softmax would produce NaN there); intentional, documented divergence.
    hasrow = (deninv[:, 0] > 0).astype(jnp.float32)
    d = 0.5 * (hasrow + colsum[0]) + 1.0                       # >= 1 -> pinv = 1/x
    dinv = 1.0 / jnp.sqrt(d)

    # ---- 5) normalized graph (2-D tiled; S^T formed in-kernel) ----
    graph_p = _call_graph_norm(
        S, rmax, deninv, dinv.reshape(Np, 1),
        rmax.reshape(1, Np), deninv.reshape(1, Np), dinv.reshape(1, Np),
        TR, TC)
    return h, graph_p[:N, :N]


# ----------------------------- demo / check ---------------------------------

if __name__ == "__main__":
    key = jax.random.PRNGKey(0)
    N, Din, Dout = 16, 32, 32
    k1, k2, k3, k4 = jax.random.split(key, 4)

    x = jax.random.normal(k1, (N, Din), jnp.float32)
    w = jax.random.normal(k2, (Dout, Din), jnp.float32) * 0.1   # nn.Linear(Din, Dout).weight
    b = jax.random.normal(k3, (Dout,), jnp.float32) * 0.1       # nn.Linear(Din, Dout).bias
    a = jax.random.normal(k4, (Dout,), jnp.float32) * 0.1       # nn.Linear(Dout, 1).weight

    # deterministic edge set: ring + skip-1 ring (unique edges, every row non-empty)
    idx = jnp.arange(N)
    src = jnp.concatenate([idx, idx])
    dst = jnp.concatenate([(idx + 1) % N, (idx + 2) % N])
    edges = jnp.stack([src, dst]).astype(jnp.int32)             # [2, 32]

    h, graph = graph_learn_forward(x, w, b, a, edges, N)
    jax.block_until_ready((h, graph))

    # pure-JAX reference
    h_ref = x @ w.T + b
    ev_ref = jnp.maximum(jnp.abs(h_ref[edges[0]] - h_ref[edges[1]]) @ a, 0.0)
    S_ref = jnp.full((N, N), -jnp.inf, jnp.float32).at[edges[0], edges[1]].set(ev_ref)
    P_ref = jax.nn.softmax(S_ref, axis=1)
    G_ref = 0.5 * (P_ref + P_ref.T) + jnp.eye(N, dtype=jnp.float32)
    d_ref = 1.0 / jnp.sqrt(jnp.sum(G_ref, axis=1))
    G_ref = d_ref[:, None] * G_ref * d_ref[None, :]

    assert jnp.allclose(h, h_ref, atol=1e-4, rtol=1e-3), "h mismatch"
    assert jnp.allclose(graph, G_ref, atol=1e-4, rtol=1e-3), "graph mismatch"
    print("KERNEL_OK")
</pallas_src>

<mosaic_0001>
module attributes {stable_mosaic.version = 11 : i64} {
  func.func @linear_kernel(%arg0: i32, %arg1: memref<256x32xf32, #tpu.memory_space<vmem>>, %arg2: memref<32x32xf32, #tpu.memory_space<vmem>>, %arg3: memref<1x32xf32, #tpu.memory_space<vmem>>, %arg4: memref<256x32xf32, #tpu.memory_space<vmem>>) attributes {dimension_semantics = [#tpu.dimension_semantics<parallel>], iteration_bounds = array<i64: 1>, scalar_prefetch = 0 : i64, scratch_operands = 0 : i64, tpu.core_type = #tpu.core_type<tc>, window_params = [{transform_indices = @transform_0, window_bounds = array<i64: 256, 32>}, {pipeline_mode = #tpu.pipeline_mode<synchronous>, transform_indices = @transform_1, window_bounds = array<i64: 32, 32>}, {pipeline_mode = #tpu.pipeline_mode<synchronous>, transform_indices = @transform_2, window_bounds = array<i64: 1, 32>}, {transform_indices = @transform_3, window_bounds = array<i64: 256, 32>}]} {
    %c0 = arith.constant 0 : index
    %c0_0 = arith.constant 0 : index
    %0 = vector.load %arg1[%c0, %c0_0] : memref<256x32xf32, #tpu.memory_space<vmem>>, vector<256x32xf32>
    %c0_1 = arith.constant 0 : index
    %c0_2 = arith.constant 0 : index
    %1 = vector.load %arg2[%c0_1, %c0_2] : memref<32x32xf32, #tpu.memory_space<vmem>>, vector<32x32xf32>
    %cst = arith.constant dense<0.000000e+00> : vector<256x32xf32>
    %2 = tpu.matmul %0, %1, %cst {dimension_numbers = #tpu.dot_dimension_numbers<[1], [0], [0], [1], [0, 0, 1, 1], [], []>} : vector<256x32xf32>, vector<32x32xf32>, vector<256x32xf32> -> vector<256x32xf32>
    %c0_3 = arith.constant 0 : index
    %c0_4 = arith.constant 0 : index
    %3 = vector.load %arg3[%c0_3, %c0_4] : memref<1x32xf32, #tpu.memory_space<vmem>>, vector<1x32xf32>
    %4 = vector.broadcast %3 : vector<1x32xf32> to vector<256x32xf32>
    %5 = arith.addf %2, %4 : vector<256x32xf32>
    %c0_5 = arith.constant 0 : index
    %c0_6 = arith.constant 0 : index
    %6 = vector.load %arg4[%c0_5, %c0_6] : memref<256x32xf32, #tpu.memory_space<vmem>>, vector<256x32xf32>
    tpu.vector_store %arg4[%c0_5, %c0_6], %5 {strides = array<i32>} : memref<256x32xf32, #tpu.memory_space<vmem>>, vector<256x32xf32>,
    return
  }
  func.func @transform_0(%arg0: i32) -> (i32, i32) {
    %c0_i32 = arith.constant 0 : i32
    %c0_i32_0 = arith.constant 0 : i32
    return %arg0, %c0_i32 : i32, i32
  }
  func.func @transform_1(%arg0: i32) -> (i32, i32) {
    %c0_i32 = arith.constant 0 : i32
    %c0_i32_0 = arith.constant 0 : i32
    %c0_i32_1 = arith.constant 0 : i32
    return %c0_i32, %c0_i32_0 : i32, i32
  }
  func.func @transform_2(%arg0: i32) -> (i32, i32) {
    %c0_i32 = arith.constant 0 : i32
    %c0_i32_0 = arith.constant 0 : i32
    %c0_i32_1 = arith.constant 0 : i32
    return %c0_i32, %c0_i32_0 : i32, i32
  }
  func.func @transform_3(%arg0: i32) -> (i32, i32) {
    %c0_i32 = arith.constant 0 : i32
    %c0_i32_0 = arith.constant 0 : i32
    return %arg0, %c0_i32 : i32, i32
  }
}

</mosaic_0001>

<bundles_post_ra>
// kernel: tpu_custom_call.1
= control target key start
LH: loop header
LB: loop body
LE: loop exit
PB: predicated region body
PF: predicated region fallthrough
CT: control target
= control target key end

     0   :  { %vm57_vm0 = vcmask 261120   ;;  %s877_s1 = inlined_call_operand.vmem [shape: f32[32,32], index: 1, kind: input, shape index: {}]   ;;  %s878_s0 = inlined_call_operand.vmem [shape: f32[256,32], index: 0, kind: input, shape index: {}]   ;;  %s879_s2 = inlined_call_operand.vmem [shape: f32[1,32], index: 2, kind: input, shape index: {}]   ;;  %s880_s3 = inlined_call_operand.vmem [shape: f32[256,32], index: 3, kind: output, shape index: {}]  }
   0x1   :  { %v46_v0 = vld [vmem:[%s877_s1] sm:$0xff]  ;;  %v47_v1 = vld [vmem:[%s877_s1 + $0x8] sm:$0xff]  ;;  %v48_v2 = vld [vmem:[%s877_s1 + $0x10] sm:$0xff] }
   0x2   :  { %v540_v3 = vpack.c.bf16 %v47_v1, %v46_v0  ;;  %v49_v4 = vld [vmem:[%s877_s1 + $0x18] sm:$0xff]  ;;  %v14_v5 = vld [vmem:[%s878_s0] sm:$0xff]  ;;  %v15_v8 = vld [vmem:[%s878_s0 + $0x8] sm:$0xff] }
   0x3   :  { %v30_v6 = vld [vmem:[%s878_s0 + $0x80] sm:$0xff]  ;;  %v544_v7 = vpack.c.bf16 %v49_v4, %v48_v2  ;;  %492 = vmatprep.mubr.msk.f32.mxu0 %vm57_vm0, %v14_v5  ;;  %v31_v9 = vld [vmem:[%s878_s0 + $0x88] sm:$0xff]  ;;  %v16_v10 = vld [vmem:[%s878_s0 + $0x10] sm:$0xff] }
   0x4   :  { %516 = vmatprep.mubr.msk.f32.mxu1 %vm57_vm0, %v30_v6  ;;  %541 = vmatprep.subr.bf16.mxu0 %v540_v3  ;;  %v32_v11 = vld [vmem:[%s878_s0 + $0x90] sm:$0xff]  ;;  %v17_v12 = vld [vmem:[%s878_s0 + $0x18] sm:$0xff]  ;;  %v18_v14 = vld [vmem:[%s878_s0 + $0x20] sm:$0xff] }
   0x5   :  { %548 = vmatprep.subr.bf16.mxu1 %v540_v3  ;;  %543 = vmatpush3.bf16.msra.mxu0 %v540_v3  ;;  %v33_v13 = vld [vmem:[%s878_s0 + $0x98] sm:$0xff]  ;;  %v34_v15 = vld [vmem:[%s878_s0 + $0xa0] sm:$0xff]  ;;  %v19_v16 = vld [vmem:[%s878_s0 + $0x28] sm:$0xff] }
   0x6   :  { %550 = vmatpush3.bf16.msra.mxu1 %v540_v3  ;;  %545 = vmatprep.subr.bf16.mxu0 %v544_v7  ;;  %v35_v17 = vld [vmem:[%s878_s0 + $0xa8] sm:$0xff]  ;;  %v20_v18 = vld [vmem:[%s878_s0 + $0x30] sm:$0xff]  ;;  %v21_v20 = vld [vmem:[%s878_s0 + $0x38] sm:$0xff] }
   0x7   :  { %549 = vmatprep.subr.bf16.mxu1 %v544_v7  ;;  %v36_v19 = vld [vmem:[%s878_s0 + $0xb0] sm:$0xff]  ;;  %v37_v21 = vld [vmem:[%s878_s0 + $0xb8] sm:$0xff]  ;;  %v22_v22 = vld [vmem:[%s878_s0 + $0x40] sm:$0xff] }
   0x8   :  { %v38_v23 = vld [vmem:[%s878_s0 + $0xc0] sm:$0xff]  ;;  %v23_v24 = vld [vmem:[%s878_s0 + $0x48] sm:$0xff]  ;;  %v24_v26 = vld [vmem:[%s878_s0 + $0x50] sm:$0xff] }
   0x9   :  { %547 = vmatpush3.bf16.msra.mxu0 %v544_v7  ;;  %v39_v25 = vld [vmem:[%s878_s0 + $0xc8] sm:$0xff]  ;;  %v40_v27 = vld [vmem:[%s878_s0 + $0xd0] sm:$0xff]  ;;  %v25_v28 = vld [vmem:[%s878_s0 + $0x58] sm:$0xff] }
   0xa   :  { %551 = vmatpush3.bf16.msra.mxu1 %v544_v7  ;;  %v41_v29 = vld [vmem:[%s878_s0 + $0xd8] sm:$0xff]  ;;  %v26_v30 = vld [vmem:[%s878_s0 + $0x60] sm:$0xff]  ;;  %v27_v32 = vld [vmem:[%s878_s0 + $0x68] sm:$0xff] }
   0xb   :  { %v42_v31 = vld [vmem:[%s878_s0 + $0xe0] sm:$0xff]  ;;  %v43_v33 = vld [vmem:[%s878_s0 + $0xe8] sm:$0xff]  ;;  %v28_v34 = vld [vmem:[%s878_s0 + $0x70] sm:$0xff] }
   0xc   :  { %493 = vmatmul.mubr.msk.f32.vlgmr.msra.gmra.mrb[0].mxu0 %vm57_vm0, %v15_v8  ;;  %v44_v35 = vld [vmem:[%s878_s0 + $0xf0] sm:$0xff]  ;;  %v29_v36 = vld [vmem:[%s878_s0 + $0x78] sm:$0xff]  ;;  %v715_v38 = vld [vmem:[%s879_s2] ss:$0 sm:$0xff] }
   0xd   :  { %517 = vmatmul.mubr.msk.f32.vlgmr.msra.gmra.mrb[0].mxu1 %vm57_vm0, %v31_v9  ;;  %495 = vmatprep.mubr.msk.f32.mxu0 %vm57_vm0, %v16_v10  ;;  %v45_v37 = vld [vmem:[%s878_s0 + $0xf8] sm:$0xff] }
   0xe   :  { %519 = vmatprep.mubr.msk.f32.mxu1 %vm57_vm0, %v32_v11 }
  0x10   :  { %496 = vmatmul.mubr.msk.f32.gmra.mrb[2].mxu0 %vm57_vm0, %v17_v12 }
  0x11   :  { %520 = vmatmul.mubr.msk.f32.gmra.mrb[2].mxu1 %vm57_vm0, %v33_v13  ;;  %498 = vmatprep.mubr.msk.f32.mxu0 %vm57_vm0, %v18_v14 }
  0x12   :  { %522 = vmatprep.mubr.msk.f32.mxu1 %vm57_vm0, %v34_v15 }
  0x14   :  { %499 = vmatmul.mubr.msk.f32.gmra.mrb[4].mxu0 %vm57_vm0, %v19_v16 }
  0x15   :  { %523 = vmatmul.mubr.msk.f32.gmra.mrb[4].mxu1 %vm57_vm0, %v35_v17  ;;  %501 = vmatprep.mubr.msk.f32.mxu0 %vm57_vm0, %v20_v18 }
  0x16   :  { %525 = vmatprep.mubr.msk.f32.mxu1 %vm57_vm0, %v36_v19 }
  0x18   :  { %502 = vmatmul.mubr.msk.f32.gmra.mrb[6].mxu0 %vm57_vm0, %v21_v20 }
  0x19   :  { %526 = vmatmul.mubr.msk.f32.gmra.mrb[6].mxu1 %vm57_vm0, %v37_v21  ;;  %504 = vmatprep.mubr.msk.f32.mxu0 %vm57_vm0, %v22_v22 }
  0x1a   :  { %528 = vmatprep.mubr.msk.f32.mxu1 %vm57_vm0, %v38_v23 }
  0x1c   :  { %505 = vmatmul.mubr.msk.f32.gmra.mrb[8].mxu0 %vm57_vm0, %v23_v24 }
  0x1d   :  { %529 = vmatmul.mubr.msk.f32.gmra.mrb[8].mxu1 %vm57_vm0, %v39_v25  ;;  %507 = vmatprep.mubr.msk.f32.mxu0 %vm57_vm0, %v24_v26 }
  0x1e   :  { %531 = vmatprep.mubr.msk.f32.mxu1 %vm57_vm0, %v40_v27 }
  0x20   :  { %508 = vmatmul.mubr.msk.f32.gmra.mrb[10].mxu0 %vm57_vm0, %v25_v28 }
  0x21   :  { %532 = vmatmul.mubr.msk.f32.gmra.mrb[10].mxu1 %vm57_vm0, %v41_v29  ;;  %510 = vmatprep.mubr.msk.f32.mxu0 %vm57_vm0, %v26_v30 }
  0x22   :  { %534 = vmatprep.mubr.msk.f32.mxu1 %vm57_vm0, %v42_v31 }
  0x24   :  { %511 = vmatmul.mubr.msk.f32.gmra.mrb[12].mxu0 %vm57_vm0, %v27_v32 }
  0x25   :  { %535 = vmatmul.mubr.msk.f32.gmra.mrb[12].mxu1 %vm57_vm0, %v43_v33  ;;  %513 = vmatprep.mubr.msk.f32.mxu0 %vm57_vm0, %v28_v34 }
  0x26   :  { %537 = vmatprep.mubr.msk.f32.mxu1 %vm57_vm0, %v44_v35 }
  0x28   :  { %514 = vmatmul.mubr.msk.f32.gmra.mrb[14].mxu0 %vm57_vm0, %v29_v36 }
  0x29   :  { %538 = vmatmul.mubr.msk.f32.gmra.mrb[14].mxu1 %vm57_vm0, %v45_v37 }
  0xdf   :  { %v494_v39 = vpop.f32.mrb[0].mxu0 }
  0xe0   :  { %v518_v40 = vpop.f32.mrb[0].mxu1  ;;  %v226_v41 = vadd.f32 %v494_v39, %v715_v38  ;;  %v220_v43 = vpop.f32.mrb[1].mxu0 }
  0xe1   :  { %v306_v42 = vadd.f32 %v518_v40, %v715_v38  ;;  %v300_v44 = vpop.f32.mrb[1].mxu1  ;;  %v221_v45 = vadd.f32 %v715_v38, %v220_v43 }
  0xe2   :  { %v301_v46 = vadd.f32 %v715_v38, %v300_v44  ;;  %380 = vst.msk [vmem:[%s880_s3 + $0x8] sm:$0xff] %vm57_vm0, %v226_v41 }
  0xe3   :  { %396 = vst.msk [vmem:[%s880_s3 + $0x88] sm:$0xff] %vm57_vm0, %v306_v42  ;;  %379 = vst.msk [vmem:[%s880_s3] sm:$0xff] %vm57_vm0, %v221_v45  ;;  %v497_v47 = vpop.f32.mrb[2].mxu0 }
  0xe4   :  { %395 = vst.msk [vmem:[%s880_s3 + $0x80] sm:$0xff] %vm57_vm0, %v301_v46  ;;  %v521_v48 = vpop.f32.mrb[2].mxu1  ;;  %v236_v49 = vadd.f32 %v497_v47, %v715_v38  ;;  %v230_v51 = vpop.f32.mrb[3].mxu0 }
  0xe5   :  { %v316_v50 = vadd.f32 %v521_v48, %v715_v38  ;;  %v310_v52 = vpop.f32.mrb[3].mxu1  ;;  %v231_v53 = vadd.f32 %v715_v38, %v230_v51 }
  0xe6   :  { %v311_v54 = vadd.f32 %v715_v38, %v310_v52  ;;  %382 = vst.msk [vmem:[%s880_s3 + $0x18] sm:$0xff] %vm57_vm0, %v236_v49 }
  0xe7   :  { %398 = vst.msk [vmem:[%s880_s3 + $0x98] sm:$0xff] %vm57_vm0, %v316_v50  ;;  %381 = vst.msk [vmem:[%s880_s3 + $0x10] sm:$0xff] %vm57_vm0, %v231_v53  ;;  %v500_v55 = vpop.f32.mrb[4].mxu0 }
  0xe8   :  { %397 = vst.msk [vmem:[%s880_s3 + $0x90] sm:$0xff] %vm57_vm0, %v311_v54  ;;  %v524_v56 = vpop.f32.mrb[4].mxu1  ;;  %v246_v57 = vadd.f32 %v500_v55, %v715_v38  ;;  %v240_v59 = vpop.f32.mrb[5].mxu0 }
  0xe9   :  { %v326_v58 = vadd.f32 %v524_v56, %v715_v38  ;;  %v320_v60 = vpop.f32.mrb[5].mxu1  ;;  %v241_v61 = vadd.f32 %v715_v38, %v240_v59 }
  0xea   :  { %v321_v62 = vadd.f32 %v715_v38, %v320_v60  ;;  %384 = vst.msk [vmem:[%s880_s3 + $0x28] sm:$0xff] %vm57_vm0, %v246_v57 }
  0xeb   :  { %400 = vst.msk [vmem:[%s880_s3 + $0xa8] sm:$0xff] %vm57_vm0, %v326_v58  ;;  %383 = vst.msk [vmem:[%s880_s3 + $0x20] sm:$0xff] %vm57_vm0, %v241_v61  ;;  %v503_v63 = vpop.f32.mrb[6].mxu0 }
  0xec   :  { %399 = vst.msk [vmem:[%s880_s3 + $0xa0] sm:$0xff] %vm57_vm0, %v321_v62  ;;  %v527_v0 = vpop.f32.mrb[6].mxu1  ;;  %v256_v1 = vadd.f32 %v503_v63, %v715_v38  ;;  %v250_v3 = vpop.f32.mrb[7].mxu0 }
  0xed   :  { %v336_v2 = vadd.f32 %v527_v0, %v715_v38  ;;  %v330_v4 = vpop.f32.mrb[7].mxu1  ;;  %v251_v5 = vadd.f32 %v715_v38, %v250_v3 }
  0xee   :  { %v331_v6 = vadd.f32 %v715_v38, %v330_v4  ;;  %386 = vst.msk [vmem:[%s880_s3 + $0x38] sm:$0xff] %vm57_vm0, %v256_v1 }
  0xef   :  { %402 = vst.msk [vmem:[%s880_s3 + $0xb8] sm:$0xff] %vm57_vm0, %v336_v2  ;;  %385 = vst.msk [vmem:[%s880_s3 + $0x30] sm:$0xff] %vm57_vm0, %v251_v5  ;;  %v506_v7 = vpop.f32.mrb[8].mxu0 }
  0xf0   :  { %401 = vst.msk [vmem:[%s880_s3 + $0xb0] sm:$0xff] %vm57_vm0, %v331_v6  ;;  %v530_v8 = vpop.f32.mrb[8].mxu1  ;;  %v266_v9 = vadd.f32 %v506_v7, %v715_v38  ;;  %v260_v11 = vpop.f32.mrb[9].mxu0 }
  0xf1   :  { %v346_v10 = vadd.f32 %v530_v8, %v715_v38  ;;  %v340_v12 = vpop.f32.mrb[9].mxu1  ;;  %v261_v13 = vadd.f32 %v715_v38, %v260_v11 }
  0xf2   :  { %v341_v14 = vadd.f32 %v715_v38, %v340_v12  ;;  %388 = vst.msk [vmem:[%s880_s3 + $0x48] sm:$0xff] %vm57_vm0, %v266_v9 }
  0xf3   :  { %404 = vst.msk [vmem:[%s880_s3 + $0xc8] sm:$0xff] %vm57_vm0, %v346_v10  ;;  %387 = vst.msk [vmem:[%s880_s3 + $0x40] sm:$0xff] %vm57_vm0, %v261_v13  ;;  %v509_v15 = vpop.f32.mrb[10].mxu0 }
  0xf4   :  { %403 = vst.msk [vmem:[%s880_s3 + $0xc0] sm:$0xff] %vm57_vm0, %v341_v14  ;;  %v533_v16 = vpop.f32.mrb[10].mxu1  ;;  %v276_v17 = vadd.f32 %v509_v15, %v715_v38  ;;  %v270_v19 = vpop.f32.mrb[11].mxu0 }
  0xf5   :  { %v356_v18 = vadd.f32 %v533_v16, %v715_v38  ;;  %v350_v20 = vpop.f32.mrb[11].mxu1  ;;  %v271_v21 = vadd.f32 %v715_v38, %v270_v19 }
  0xf6   :  { %v351_v22 = vadd.f32 %v715_v38, %v350_v20  ;;  %390 = vst.msk [vmem:[%s880_s3 + $0x58] sm:$0xff] %vm57_vm0, %v276_v17 }
  0xf7   :  { %406 = vst.msk [vmem:[%s880_s3 + $0xd8] sm:$0xff] %vm57_vm0, %v356_v18  ;;  %389 = vst.msk [vmem:[%s880_s3 + $0x50] sm:$0xff] %vm57_vm0, %v271_v21  ;;  %v512_v23 = vpop.f32.mrb[12].mxu0 }
  0xf8   :  { %405 = vst.msk [vmem:[%s880_s3 + $0xd0] sm:$0xff] %vm57_vm0, %v351_v22  ;;  %v536_v24 = vpop.f32.mrb[12].mxu1  ;;  %v286_v25 = vadd.f32 %v512_v23, %v715_v38  ;;  %v280_v27 = vpop.f32.mrb[13].mxu0 }
  0xf9   :  { %v366_v26 = vadd.f32 %v536_v24, %v715_v38  ;;  %v360_v28 = vpop.f32.mrb[13].mxu1  ;;  %v281_v29 = vadd.f32 %v715_v38, %v280_v27 }
  0xfa   :  { %v361_v30 = vadd.f32 %v715_v38, %v360_v28  ;;  %392 = vst.msk [vmem:[%s880_s3 + $0x68] sm:$0xff] %vm57_vm0, %v286_v25 }
  0xfb   :  { %408 = vst.msk [vmem:[%s880_s3 + $0xe8] sm:$0xff] %vm57_vm0, %v366_v26  ;;  %391 = vst.msk [vmem:[%s880_s3 + $0x60] sm:$0xff] %vm57_vm0, %v281_v29  ;;  %v515_v31 = vpop.f32.mrb[14].mxu0 }
  0xfc   :  { %407 = vst.msk [vmem:[%s880_s3 + $0xe0] sm:$0xff] %vm57_vm0, %v361_v30  ;;  %v539_v32 = vpop.f32.mrb[14].mxu1  ;;  %v296_v33 = vadd.f32 %v515_v31, %v715_v38  ;;  %v290_v35 = vpop.f32.mrb[15].mxu0 }
  0xfd   :  { %v376_v34 = vadd.f32 %v539_v32, %v715_v38  ;;  %v370_v36 = vpop.f32.mrb[15].mxu1  ;;  %v291_v37 = vadd.f32 %v715_v38, %v290_v35 }
  0xfe   :  { %v371_v39 = vadd.f32 %v715_v38, %v370_v36  ;;  %394 = vst.msk [vmem:[%s880_s3 + $0x78] sm:$0xff] %vm57_vm0, %v296_v33 }
  0xff   :  { %410 = vst.msk [vmem:[%s880_s3 + $0xf8] sm:$0xff] %vm57_vm0, %v376_v34  ;;  %393 = vst.msk [vmem:[%s880_s3 + $0x70] sm:$0xff] %vm57_vm0, %v291_v37 }
 0x100   :  { %409 = vst.msk [vmem:[%s880_s3 + $0xf0] sm:$0xff] %vm57_vm0, %v371_v39 }

</bundles_post_ra>
